<compile_context>
chip_gen: v7x
topology: tpu7x:2x2x1
jax: 0.10.0
libtpu: 0.0.40
codegen_flags: <defaults>
</compile_context>

<pallas_src>
import math

import jax
import jax.numpy as jnp
from jax.experimental import pallas as pl
from jax.experimental.pallas import tpu as pltpu


def _round_up(n, m):
    return ((n + m - 1) // m) * m


def _pick_batch_block(B, max_tb=8):
    """Largest divisor of B (<= max_tb) that keeps >= 2 grid steps (v7x has 2 TCs)."""
    if B <= 1:
        return max(B, 1)
    best = 1
    for tb in range(1, min(max_tb, B) + 1):
        if B % tb == 0 and (B // tb) >= 2:
            best = tb
    return best


def _semantic_attention_kernel(
    q_ref, k_ref, v_ref,          # (TB, Nq, D), (TB, Nk, D), (TB, Nv, D)   bf16
    wqT_ref, bq_ref,              # (D, D) bf16 (pre-transposed, scale folded), (1, D) f32
    wkT_ref, bk_ref,
    wvT_ref, bv_ref,
    a_out_ref,                    # (TB, Nq, Nk) f32
    v_out_ref,                    # (TB, Nv, D)  f32
):
    TB, Nq, D = q_ref.shape
    _, Nk, _ = k_ref.shape
    _, Nv, _ = v_ref.shape

    # Flatten (TB, N, D) -> (TB*N, D): one tall MXU matmul per projection.
    q2 = q_ref[...].reshape(TB * Nq, D)
    k2 = k_ref[...].reshape(TB * Nk, D)
    v2 = v_ref[...].reshape(TB * Nv, D)

    # Projections: x @ W^T + b, with W^T already materialized -> no in-kernel transpose.
    # bf16 operands, f32 accumulation, f32 bias add.
    Q = jnp.dot(q2, wqT_ref[...], preferred_element_type=jnp.float32) + bq_ref[...]
    K = jnp.dot(k2, wkT_ref[...], preferred_element_type=jnp.float32) + bk_ref[...]
    V = jnp.dot(v2, wvT_ref[...], preferred_element_type=jnp.float32) + bv_ref[...]

    v_out_ref[...] = V.reshape(TB, Nv, D).astype(v_out_ref.dtype)

    # Batched Q @ K^T, contracting the last axes of both operands (no .T / XLU).
    # The 1/sqrt(D) scale was folded into wq/bq in the wrapper.
    Qb = Q.reshape(TB, Nq, D).astype(jnp.bfloat16)
    Kb = K.reshape(TB, Nk, D).astype(jnp.bfloat16)
    A = jnp.einsum("bqd,bkd->bqk", Qb, Kb, preferred_element_type=jnp.float32)
    a_out_ref[...] = A.astype(a_out_ref.dtype)


def semantic_attention(Q_input, K_input, V_input, params, *, batch_block=None):
    """params: dict with wq, bq, wk, bk, wv, bv in PyTorch convention (W: (out, in))."""
    B, Nq, D = Q_input.shape
    _, Nk, _ = K_input.shape
    _, Nv, _ = V_input.shape

    scale = 1.0 / math.sqrt(D)

    # Pre-transpose weights to (in, out), fold the scale into the Q projection,
    # cast weights to bf16; biases stay f32 (added after f32 accumulation).
    wqT = (params["wq"].astype(jnp.float32) * scale).T.astype(jnp.bfloat16)
    wkT = params["wk"].T.astype(jnp.bfloat16)
    wvT = params["wv"].T.astype(jnp.bfloat16)
    bq = (params["bq"].astype(jnp.float32) * scale).reshape(1, D)
    bk = params["bk"].astype(jnp.float32).reshape(1, D)
    bv = params["bv"].astype(jnp.float32).reshape(1, D)

    # Padding: Nq/Nv to the 8-sublane grain; Nk to 128 lanes so the A output's
    # last dim is lane-dense (unmasked stores, coalesced HBM writeback).
    Nq_p = _round_up(Nq, 8)
    Nv_p = _round_up(Nv, 8)
    Nk_p = _round_up(Nk, 128)

    def pad_n(x, n_to):
        n = x.shape[1]
        if n != n_to:
            x = jnp.pad(x, ((0, 0), (0, n_to - n), (0, 0)))
        return x.astype(jnp.bfloat16)

    Qp = pad_n(Q_input, Nq_p)
    Kp = pad_n(K_input, Nk_p)
    Vp = pad_n(V_input, Nv_p)

    TB = batch_block if batch_block is not None else _pick_batch_block(B)
    assert B % TB == 0, "batch_block must divide B"
    grid = (B // TB,)

    act_spec = lambda N: pl.BlockSpec((TB, N, D), lambda b: (b, 0, 0))
    # NOTE: the (D, D) weights use a constant index_map (whole-array blocks). For
    # very large D they should be tiled along the contraction (extra 'arbitrary'
    # grid axis + VMEM accumulator) or single-buffered in scratch to respect
    # v7x's 64 MiB VMEM; at these sizes (bf16, D=32) they are tiny.
    w_spec = pl.BlockSpec((D, D), lambda b: (0, 0))
    b_spec = pl.BlockSpec((1, D), lambda b: (0, 0))

    A_full, V_full = pl.pallas_call(
        _semantic_attention_kernel,
        out_shape=(
            jax.ShapeDtypeStruct((B, Nq_p, Nk_p), jnp.float32),
            jax.ShapeDtypeStruct((B, Nv_p, D), jnp.float32),
        ),
        grid_spec=pltpu.PrefetchScalarGridSpec(
            num_scalar_prefetch=0,
            grid=grid,
            in_specs=[
                act_spec(Nq_p), act_spec(Nk_p), act_spec(Nv_p),
                w_spec, b_spec,
                w_spec, b_spec,
                w_spec, b_spec,
            ],
            out_specs=[
                pl.BlockSpec((TB, Nq_p, Nk_p), lambda b: (b, 0, 0)),
                pl.BlockSpec((TB, Nv_p, D), lambda b: (b, 0, 0)),
            ],
        ),
        compiler_params=pltpu.CompilerParams(
            dimension_semantics=("parallel",),
            vmem_limit_bytes=64 * 1024 * 1024,
        ),
    )(Qp, Kp, Vp, wqT, bq, wkT, bk, wvT, bv)

    # Strip padding (fused under jit).
    A = A_full[:, :Nq, :Nk]
    V = V_full[:, :Nv, :]
    return A, V


def _init_params(key, input_size):
    """Deterministic init mimicking nn.Linear default (uniform +-1/sqrt(in))."""
    bound = 1.0 / math.sqrt(input_size)
    ks = jax.random.split(key, 6)
    u = lambda k, shape: jax.random.uniform(
        k, shape, dtype=jnp.float32, minval=-bound, maxval=bound)
    return {
        "wq": u(ks[0], (input_size, input_size)), "bq": u(ks[1], (input_size,)),
        "wk": u(ks[2], (input_size, input_size)), "bk": u(ks[3], (input_size,)),
        "wv": u(ks[4], (input_size, input_size)), "bv": u(ks[5], (input_size,)),
    }


def _reference(Q_input, K_input, V_input, params):
    D = Q_input.shape[-1]
    Q = Q_input @ params["wq"].T + params["bq"]
    K = K_input @ params["wk"].T + params["bk"]
    V = V_input @ params["wv"].T + params["bv"]
    A = jnp.einsum("bqd,bkd->bqk", Q, K) / math.sqrt(D)
    return A, V


if __name__ == "__main__":
    B, Nq, Nk, Nv, D = 2, 8, 8, 8, 32

    key = jax.random.PRNGKey(0)
    kq, kk, kv, kp = jax.random.split(key, 4)
    Q_input = jax.random.normal(kq, (B, Nq, D), dtype=jnp.float32)
    K_input = jax.random.normal(kk, (B, Nk, D), dtype=jnp.float32)
    V_input = jax.random.normal(kv, (B, Nv, D), dtype=jnp.float32)
    params = _init_params(kp, D)

    run = jax.jit(lambda q, k, v, p: semantic_attention(q, k, v, p))
    A, V = run(Q_input, K_input, V_input, params)
    jax.block_until_ready((A, V))

    A_ref, V_ref = _reference(Q_input, K_input, V_input, params)
    assert A.shape == (B, Nq, Nk) and V.shape == (B, Nv, D)
    # bf16 MXU path vs f32 reference: ~1e-2-level agreement expected.
    assert jnp.allclose(A, A_ref, atol=5e-2, rtol=5e-2), float(jnp.max(jnp.abs(A - A_ref)))
    assert jnp.allclose(V, V_ref, atol=5e-2, rtol=5e-2), float(jnp.max(jnp.abs(V - V_ref)))

    print("KERNEL_OK")
</pallas_src>

<mosaic_0001>
module attributes {stable_mosaic.version = 11 : i64} {
  func.func @_semantic_attention_kernel(%arg0: i32, %arg1: memref<1x8x32xbf16, #tpu.memory_space<vmem>>, %arg2: memref<1x128x32xbf16, #tpu.memory_space<vmem>>, %arg3: memref<1x8x32xbf16, #tpu.memory_space<vmem>>, %arg4: memref<32x32xbf16, #tpu.memory_space<vmem>>, %arg5: memref<1x32xf32, #tpu.memory_space<vmem>>, %arg6: memref<32x32xbf16, #tpu.memory_space<vmem>>, %arg7: memref<1x32xf32, #tpu.memory_space<vmem>>, %arg8: memref<32x32xbf16, #tpu.memory_space<vmem>>, %arg9: memref<1x32xf32, #tpu.memory_space<vmem>>, %arg10: memref<1x8x128xf32, #tpu.memory_space<vmem>>, %arg11: memref<1x8x32xf32, #tpu.memory_space<vmem>>) attributes {dimension_semantics = [#tpu.dimension_semantics<parallel>], iteration_bounds = array<i64: 2>, scalar_prefetch = 0 : i64, scratch_operands = 0 : i64, tpu.core_type = #tpu.core_type<tc>, window_params = [{transform_indices = @transform_0, window_bounds = array<i64: 1, 8, 32>}, {transform_indices = @transform_1, window_bounds = array<i64: 1, 128, 32>}, {transform_indices = @transform_2, window_bounds = array<i64: 1, 8, 32>}, {pipeline_mode = #tpu.pipeline_mode<synchronous>, transform_indices = @transform_3, window_bounds = array<i64: 32, 32>}, {pipeline_mode = #tpu.pipeline_mode<synchronous>, transform_indices = @transform_4, window_bounds = array<i64: 1, 32>}, {pipeline_mode = #tpu.pipeline_mode<synchronous>, transform_indices = @transform_5, window_bounds = array<i64: 32, 32>}, {pipeline_mode = #tpu.pipeline_mode<synchronous>, transform_indices = @transform_6, window_bounds = array<i64: 1, 32>}, {pipeline_mode = #tpu.pipeline_mode<synchronous>, transform_indices = @transform_7, window_bounds = array<i64: 32, 32>}, {pipeline_mode = #tpu.pipeline_mode<synchronous>, transform_indices = @transform_8, window_bounds = array<i64: 1, 32>}, {transform_indices = @transform_9, window_bounds = array<i64: 1, 8, 128>}, {transform_indices = @transform_10, window_bounds = array<i64: 1, 8, 32>}]} {
    %c0 = arith.constant 0 : index
    %c0_0 = arith.constant 0 : index
    %c0_1 = arith.constant 0 : index
    %0 = vector.load %arg1[%c0, %c0_0, %c0_1] : memref<1x8x32xbf16, #tpu.memory_space<vmem>>, vector<1x8x32xbf16>
    %1 = vector.shape_cast %0 : vector<1x8x32xbf16> to vector<8x32xbf16>
    %c0_2 = arith.constant 0 : index
    %c0_3 = arith.constant 0 : index
    %c0_4 = arith.constant 0 : index
    %2 = vector.load %arg2[%c0_2, %c0_3, %c0_4] : memref<1x128x32xbf16, #tpu.memory_space<vmem>>, vector<1x128x32xbf16>
    %3 = vector.shape_cast %2 : vector<1x128x32xbf16> to vector<128x32xbf16>
    %c0_5 = arith.constant 0 : index
    %c0_6 = arith.constant 0 : index
    %c0_7 = arith.constant 0 : index
    %4 = vector.load %arg3[%c0_5, %c0_6, %c0_7] : memref<1x8x32xbf16, #tpu.memory_space<vmem>>, vector<1x8x32xbf16>
    %5 = vector.shape_cast %4 : vector<1x8x32xbf16> to vector<8x32xbf16>
    %c0_8 = arith.constant 0 : index
    %c0_9 = arith.constant 0 : index
    %6 = vector.load %arg4[%c0_8, %c0_9] : memref<32x32xbf16, #tpu.memory_space<vmem>>, vector<32x32xbf16>
    %cst = arith.constant dense<0.000000e+00> : vector<8x32xf32>
    %7 = tpu.matmul %1, %6, %cst {dimension_numbers = #tpu.dot_dimension_numbers<[1], [0], [0], [1], [0, 0, 1, 1], [], []>} : vector<8x32xbf16>, vector<32x32xbf16>, vector<8x32xf32> -> vector<8x32xf32>
    %c0_10 = arith.constant 0 : index
    %c0_11 = arith.constant 0 : index
    %8 = vector.load %arg5[%c0_10, %c0_11] : memref<1x32xf32, #tpu.memory_space<vmem>>, vector<1x32xf32>
    %9 = vector.broadcast %8 : vector<1x32xf32> to vector<8x32xf32>
    %10 = arith.addf %7, %9 : vector<8x32xf32>
    %c0_12 = arith.constant 0 : index
    %c0_13 = arith.constant 0 : index
    %11 = vector.load %arg6[%c0_12, %c0_13] : memref<32x32xbf16, #tpu.memory_space<vmem>>, vector<32x32xbf16>
    %cst_14 = arith.constant dense<0.000000e+00> : vector<128x32xf32>
    %12 = tpu.matmul %3, %11, %cst_14 {dimension_numbers = #tpu.dot_dimension_numbers<[1], [0], [0], [1], [0, 0, 1, 1], [], []>} : vector<128x32xbf16>, vector<32x32xbf16>, vector<128x32xf32> -> vector<128x32xf32>
    %c0_15 = arith.constant 0 : index
    %c0_16 = arith.constant 0 : index
    %13 = vector.load %arg7[%c0_15, %c0_16] : memref<1x32xf32, #tpu.memory_space<vmem>>, vector<1x32xf32>
    %14 = vector.broadcast %13 : vector<1x32xf32> to vector<128x32xf32>
    %15 = arith.addf %12, %14 : vector<128x32xf32>
    %c0_17 = arith.constant 0 : index
    %c0_18 = arith.constant 0 : index
    %16 = vector.load %arg8[%c0_17, %c0_18] : memref<32x32xbf16, #tpu.memory_space<vmem>>, vector<32x32xbf16>
    %cst_19 = arith.constant dense<0.000000e+00> : vector<8x32xf32>
    %17 = tpu.matmul %5, %16, %cst_19 {dimension_numbers = #tpu.dot_dimension_numbers<[1], [0], [0], [1], [0, 0, 1, 1], [], []>} : vector<8x32xbf16>, vector<32x32xbf16>, vector<8x32xf32> -> vector<8x32xf32>
    %c0_20 = arith.constant 0 : index
    %c0_21 = arith.constant 0 : index
    %18 = vector.load %arg9[%c0_20, %c0_21] : memref<1x32xf32, #tpu.memory_space<vmem>>, vector<1x32xf32>
    %19 = vector.broadcast %18 : vector<1x32xf32> to vector<8x32xf32>
    %20 = arith.addf %17, %19 : vector<8x32xf32>
    %21 = vector.shape_cast %20 : vector<8x32xf32> to vector<1x8x32xf32>
    %c0_22 = arith.constant 0 : index
    %c0_23 = arith.constant 0 : index
    %c0_24 = arith.constant 0 : index
    %22 = vector.load %arg11[%c0_22, %c0_23, %c0_24] : memref<1x8x32xf32, #tpu.memory_space<vmem>>, vector<1x8x32xf32>
    tpu.vector_store %arg11[%c0_22, %c0_23, %c0_24], %21 {strides = array<i32>} : memref<1x8x32xf32, #tpu.memory_space<vmem>>, vector<1x8x32xf32>,
    %23 = vector.shape_cast %10 : vector<8x32xf32> to vector<1x8x32xf32>
    %24 = arith.truncf %23 : vector<1x8x32xf32> to vector<1x8x32xbf16>
    %25 = vector.shape_cast %15 : vector<128x32xf32> to vector<1x128x32xf32>
    %26 = arith.truncf %25 : vector<1x128x32xf32> to vector<1x128x32xbf16>
    "tpu.trace_start"() <{level = 10 : i32, message = "bqd,bkd->bqk"}> : () -> ()
    %cst_25 = arith.constant dense<0.000000e+00> : vector<1x8x128xf32>
    %27 = tpu.matmul %24, %26, %cst_25 {dimension_numbers = #tpu.dot_dimension_numbers<[2], [2], [1], [1], [0, 0, 0, 1, 1, 1], [0], [0]>} : vector<1x8x32xbf16>, vector<1x128x32xbf16>, vector<1x8x128xf32> -> vector<1x8x128xf32>
    "tpu.trace_stop"() : () -> ()
    %c0_26 = arith.constant 0 : index
    %c0_27 = arith.constant 0 : index
    %c0_28 = arith.constant 0 : index
    %28 = vector.load %arg10[%c0_26, %c0_27, %c0_28] : memref<1x8x128xf32, #tpu.memory_space<vmem>>, vector<1x8x128xf32>
    tpu.vector_store %arg10[%c0_26, %c0_27, %c0_28], %27 {strides = array<i32>} : memref<1x8x128xf32, #tpu.memory_space<vmem>>, vector<1x8x128xf32>,
    return
  }
  func.func @transform_0(%arg0: i32) -> (i32, i32, i32) {
    %c0_i32 = arith.constant 0 : i32
    %c0_i32_0 = arith.constant 0 : i32
    %c0_i32_1 = arith.constant 0 : i32
    return %arg0, %c0_i32, %c0_i32_0 : i32, i32, i32
  }
  func.func @transform_1(%arg0: i32) -> (i32, i32, i32) {
    %c0_i32 = arith.constant 0 : i32
    %c0_i32_0 = arith.constant 0 : i32
    %c0_i32_1 = arith.constant 0 : i32
    return %arg0, %c0_i32, %c0_i32_0 : i32, i32, i32
  }
  func.func @transform_2(%arg0: i32) -> (i32, i32, i32) {
    %c0_i32 = arith.constant 0 : i32
    %c0_i32_0 = arith.constant 0 : i32
    %c0_i32_1 = arith.constant 0 : i32
    return %arg0, %c0_i32, %c0_i32_0 : i32, i32, i32
  }
  func.func @transform_3(%arg0: i32) -> (i32, i32) {
    %c0_i32 = arith.constant 0 : i32
    %c0_i32_0 = arith.constant 0 : i32
    %c0_i32_1 = arith.constant 0 : i32
    return %c0_i32, %c0_i32_0 : i32, i32
  }
  func.func @transform_4(%arg0: i32) -> (i32, i32) {
    %c0_i32 = arith.constant 0 : i32
    %c0_i32_0 = arith.constant 0 : i32
    %c0_i32_1 = arith.constant 0 : i32
    return %c0_i32, %c0_i32_0 : i32, i32
  }
  func.func @transform_5(%arg0: i32) -> (i32, i32) {
    %c0_i32 = arith.constant 0 : i32
    %c0_i32_0 = arith.constant 0 : i32
    %c0_i32_1 = arith.constant 0 : i32
    return %c0_i32, %c0_i32_0 : i32, i32
  }
  func.func @transform_6(%arg0: i32) -> (i32, i32) {
    %c0_i32 = arith.constant 0 : i32
    %c0_i32_0 = arith.constant 0 : i32
    %c0_i32_1 = arith.constant 0 : i32
    return %c0_i32, %c0_i32_0 : i32, i32
  }
  func.func @transform_7(%arg0: i32) -> (i32, i32) {
    %c0_i32 = arith.constant 0 : i32
    %c0_i32_0 = arith.constant 0 : i32
    %c0_i32_1 = arith.constant 0 : i32
    return %c0_i32, %c0_i32_0 : i32, i32
  }
  func.func @transform_8(%arg0: i32) -> (i32, i32) {
    %c0_i32 = arith.constant 0 : i32
    %c0_i32_0 = arith.constant 0 : i32
    %c0_i32_1 = arith.constant 0 : i32
    return %c0_i32, %c0_i32_0 : i32, i32
  }
  func.func @transform_9(%arg0: i32) -> (i32, i32, i32) {
    %c0_i32 = arith.constant 0 : i32
    %c0_i32_0 = arith.constant 0 : i32
    %c0_i32_1 = arith.constant 0 : i32
    return %arg0, %c0_i32, %c0_i32_0 : i32, i32, i32
  }
  func.func @transform_10(%arg0: i32) -> (i32, i32, i32) {
    %c0_i32 = arith.constant 0 : i32
    %c0_i32_0 = arith.constant 0 : i32
    %c0_i32_1 = arith.constant 0 : i32
    return %arg0, %c0_i32, %c0_i32_0 : i32, i32, i32
  }
}

</mosaic_0001>

<bundles_post_ra>
// kernel: _lambda_.1
= control target key start
LH: loop header
LB: loop body
LE: loop exit
PB: predicated region body
PF: predicated region fallthrough
CT: control target
= control target key end

     0   :  { %s2400_s0 = inlined_call_operand.hbm [shape: bf16[2,8,32], index: 0, kind: input, shape index: {}]   ;;  %s2401_s1 = inlined_call_operand.hbm [shape: bf16[2,128,32], index: 1, kind: input, shape index: {}]   ;;  %s2402_s2 = inlined_call_operand.hbm [shape: bf16[2,8,32], index: 2, kind: input, shape index: {}]   ;;  %s2403_s3 = inlined_call_operand.hbm [shape: bf16[32,32], index: 3, kind: input, shape index: {}]   ;;  %s2404_s4 = inlined_call_operand.hbm [shape: f32[1,32], index: 4, kind: input, shape index: {}]   ;;  %s2405_s5 = inlined_call_operand.hbm [shape: bf16[32,32], index: 5, kind: input, shape index: {}]   ;;  %s2406_s6 = inlined_call_operand.hbm [shape: f32[1,32], index: 6, kind: input, shape index: {}]   ;;  %s2407_s7 = inlined_call_operand.hbm [shape: bf16[32,32], index: 7, kind: input, shape index: {}]   ;;  %s2408_s8 = inlined_call_operand.hbm [shape: f32[1,32], index: 8, kind: input, shape index: {}]   ;;  %s2409_s9 = inlined_call_operand.hbm [shape: f32[2,8,128], index: 9, kind: output, shape index: {0}]   ;;  %s2410_s10 = inlined_call_operand.hbm [shape: f32[2,8,32], index: 10, kind: output, shape index: {1}]  }
   0x1   :  { %2434 = sst [smem:[#allocation33_spill]] %s2401_s1 }
   0x2   :  { %2435 = sst [smem:[#allocation34_spill]] %s2403_s3 }
   0x3   :  { %2436 = sst [smem:[#allocation35_spill]] %s2405_s5 }
   0x4   :  { %2437 = sst [smem:[#allocation36_spill]] %s2407_s7 }
   0x5   :  { %2438 = sst [smem:[#allocation37_spill]] %s2409_s9 }
   0x6   :  { %2439 = sst [smem:[#allocation38_spill]] %s2410_s10 }
   0x7   :  { %16 = vsyncpa [#allocation3], 0 }
   0x8   :  { %18 = vsyncpa [#allocation3 + $0x1], 0 }
   0x9   :  { %19 = vsyncpa [#allocation6], 0 }
   0xa   :  { %21 = vsyncpa [#allocation6 + $0x1], 0 }
   0xb   :  { %22 = vsyncpa [#allocation9], 0 }
   0xc   :  { %23 = vsyncpa [#allocation12], 0 }
   0xd   :  { %24 = vsyncpa [#allocation15], 0 }
   0xe   :  { %25 = vsyncpa [#allocation4], 0 }
   0xf   :  { %27 = vsyncpa [#allocation4 + $0x1], 0 }
  0x10   :  { %28 = vsyncpa [#allocation19], 0 }
  0x11   :  { %30 = vsyncpa [#allocation19 + $0x1], 0  ;;  %s1917_s13 = smov 0   ;;  %s1919_s14 = smov 0  }
  0x12   :  { %s1921_s15 = smov 0   ;;  %s1923_s16 = smov 0  }
  0x13 LB: > { %2440 = sst [smem:[#allocation27_spill]] %s1833_s13  ;;  %s1847_s17 = smov [#allocation8]   ;;  %s1845_s16 = sphi %s1923_s16, %s2482_s16   ;;  %s1841_s15 = sphi %s1921_s15, %s2484_s15   ;;  %s1837_s14 = sphi %s1919_s14, %s2486_s14   ;;  %s1833_s13 = sphi %s1917_s13, %s2485_s13  }
  0x14   : > { %2441 = sst [smem:[#allocation28_spill]] %s1841_s15  ;;  %s309_s18 = sshll.u32 %s1847_s17, 4  ;;  %s1943_s18 = int_to_ptr.vmem [resolvable:$true] %s309_s18 }
  0x15   : > { %s1938_s19 = sadd.s32 4294967295, %s1845_s16   ;;  %p1190_p0 = scmp.ge.s32.totalorder %s1845_s16, 1 }
  0x16   : > { %p2416_p1 = scmp.eq.s32.totalorder %s1938_s19, 0  ;;  %p297_p2 = scmp.lt.s32.totalorder %s1845_s16, 3 }
  0x17   : > { %s1848_s21 = smov [#allocation11]   ;;  %s1849_s24 = smov [#allocation14]  }
  0x18   : > { %p1945_p3 = pnand %p1190_p0, %p297_p2  ;;  %s333_s22 = sshll.u32 %s1848_s21, 4  ;;  %s1958_s22 = int_to_ptr.vmem [resolvable:$true] %s333_s22 }
  0x19   : > { %s357_s25 = sshll.u32 %s1849_s24, 4  ;;  %s2444_s3 = sld [smem:[#allocation34_spill]]  ;;  %s1960_s25 = int_to_ptr.vmem [resolvable:$true] %s357_s25 }
  0x1a   : > { %s2442_s20 = scalar_select %p1945_p3, 1, 0 }
  0x1b   : > { %p1367_p5 = pneg %p1945_p3 }
  0x1d   : > { %p1954_p6 = pnand %p1367_p5, %p2416_p1 }
  0x1f   : > { %s2443_s23 = scalar_select %p1954_p6, 1, 0 }
  0x20   : > { %s1473_s28 = scalar_lea.hbm %s2444_s3, 256  ;;  %p1970_p8 = pneg %p1954_p6 }
  0x21   : > { %p1474_p7 = scmp.ne.s32.totalorder %s2444_s3, %s1473_s28  ;;  %p1480_p11 = scmp.lt.u32.totalorder %s1473_s28, %s2444_s3 }
  0x22   : > { %s2445_s11 = scalar_select %p1970_p8, 1, 0 }
  0x23   : > { %p1476_p9 = pnand %p1970_p8, %p1474_p7 }
  0x25   : > { %p1477_p10 = pneg %p1476_p9 }
  0x27   : > { %p1482_p12 = pnand %p1480_p11, %p1477_p10 }
  0x29   : > { %1485 = shalt.err (!%p1482_p12)
}
  0x2a   : > { %s1486_s21 = scalar_lea.vmem %s1943_s18, 256  ;;  %p1494_p5 = scmp.lt.s32.totalorder %s1943_s18, %s1943_s18 }
  0x2b   : > { %p1487_p13 = scmp.ne.s32.totalorder %s1943_s18, %s1486_s21  ;;  %p1495_p4 = scmp.lt.s32.totalorder %s1486_s21, %s1486_s21 }
  0x2d   : > { %p1489_p0 = pnand %p1487_p13, %p1970_p8  ;;  %p1496_p7 = por %p1495_p4, %p1494_p5 }
  0x2f   : > { %p1490_p2 = pneg %p1489_p0 }
  0x31   : > { %p1497_p9 = pnand %p1496_p7, %p1490_p2 }
  0x33   : > { %1500 = shalt.err (!%p1497_p9)
}
  0x34   : > { %s2414_s24 = smov 64   ;;  %s2415_s26 = smov 4  }
  0x35   : > { %1370 = dma.hbm_to_vmem [thread:$0]  (!%p1954_p6), %s2444_s3, 256, %s1943_s18, [#allocation9], %s2414_s24, %s2414_s24, %s2415_s26  }
  0x36   : > { %s2446_s5 = sld [smem:[#allocation35_spill]] }
  0x3c   : > { %s1501_s12 = scalar_lea.hbm %s2446_s5, 256 }
  0x3d   : > { %p1502_p4 = scmp.ne.s32.totalorder %s2446_s5, %s1501_s12  ;;  %p1508_p12 = scmp.lt.u32.totalorder %s1501_s12, %s2446_s5 }
  0x3f   : > { %p1504_p10 = pnand %p1502_p4, %p1970_p8 }
  0x41   : > { %p1505_p11 = pneg %p1504_p10 }
  0x43   : > { %p1510_p13 = pnand %p1508_p12, %p1505_p11 }
  0x45   : > { %1513 = shalt.err (!%p1510_p13)
}
  0x46   : > { %s1514_s18 = scalar_lea.vmem %s1958_s22, 256  ;;  %p1522_p7 = scmp.lt.s32.totalorder %s1958_s22, %s1958_s22 }
  0x47   : > { %p1515_p0 = scmp.ne.s32.totalorder %s1958_s22, %s1514_s18  ;;  %p1523_p9 = scmp.lt.s32.totalorder %s1514_s18, %s1514_s18 }
  0x49   : > { %p1517_p2 = pnand %p1515_p0, %p1970_p8  ;;  %p1524_p4 = por %p1523_p9, %p1522_p7 }
  0x4b   : > { %p1518_p5 = pneg %p1517_p2 }
  0x4d   : > { %p1525_p10 = pnand %p1524_p4, %p1518_p5 }
  0x4f   : > { %1528 = shalt.err (!%p1525_p10)
}
  0x50   : > { %1376 = dma.hbm_to_vmem [thread:$0]  (!%p1954_p6), %s2446_s5, 256, %s1958_s22, [#allocation12], %s2414_s24, %s2414_s24, %s2415_s26  }
  0x51   : > { %s2447_s7 = sld [smem:[#allocation36_spill]] }
  0x57   : > { %s1529_s29 = scalar_lea.hbm %s2447_s7, 256 }
  0x58   : > { %p1530_p11 = scmp.ne.s32.totalorder %s2447_s7, %s1529_s29  ;;  %p1536_p0 = scmp.lt.u32.totalorder %s1529_s29, %s2447_s7 }
  0x5a   : > { %p1532_p12 = pnand %p1530_p11, %p1970_p8 }
  0x5c   : > { %p1533_p13 = pneg %p1532_p12 }
  0x5e   : > { %p1538_p2 = pnand %p1536_p0, %p1533_p13 }
  0x60   : > { %1541 = shalt.err (!%p1538_p2)
}
  0x61   : > { %s1542_s22 = scalar_lea.vmem %s1960_s25, 256  ;;  %p1550_p4 = scmp.lt.s32.totalorder %s1960_s25, %s1960_s25 }
  0x62   : > { %p1543_p5 = scmp.ne.s32.totalorder %s1960_s25, %s1542_s22  ;;  %p1551_p10 = scmp.lt.s32.totalorder %s1542_s22, %s1542_s22 }
  0x64   : > { %p1545_p7 = pnand %p1543_p5, %p1970_p8  ;;  %p1552_p11 = por %p1551_p10, %p1550_p4 }
  0x66   : > { %p1546_p9 = pneg %p1545_p7 }
  0x68   : > { %p1553_p12 = pnand %p1552_p11, %p1546_p9 }
  0x6a   : > { %1556 = shalt.err (!%p1553_p12)
}
  0x6b   : > { %1382 = dma.hbm_to_vmem [thread:$0]  (!%p1954_p6), %s2447_s7, 256, %s1960_s25, [#allocation15], %s2414_s24, %s2414_s24, %s2415_s26  }
  0x6c   : > { %s1189_s10 = sadd.s32 4294967294, %s1845_s16   ;;  %s2048_s27 = sadd.s32 1, %s1845_s16  }
  0x6d   : > { %2448 = sst [smem:[#allocation29_spill]] %s2048_s27  ;;  %s43_s28 = sadd.s32 1, %s1841_s15 }
  0x6e   : > { %s40_s29 = ssub.s32 %s1845_s16, %s2048_s27  ;;  %p50_p13 = scmp.ne.s32.totalorder %s1841_s15, %s1837_s14 }
  0x6f   : > { %p41_p0 = scmp.eq.s32.totalorder %s40_s29, 0  ;;  %p51_p2 = scmp.eq.s32.totalorder %s1845_s16, 0 }
  0x70   : > { %p56_p5 = scmp.ne.s32.totalorder %s1837_s14, %s1833_s13  ;;  %p258_p7 = scmp.eq.s32.totalorder %s1938_s19, 1 }
  0x71   : > { %s2060_s30 = scalar_select %p41_p0, %s1841_s15, %s43_s28  }
  0x72   : > { %p52_p9 = por %p51_p2, %p50_p13  ;;  %p2064_p4 = por %p2416_p1, %p56_p5 }
  0x73   : > { %2449 = sst [smem:[#allocation30_spill]] %s2060_s30  ;;  %p2068_p10 = por %p258_p7, %p50_p13 }
  0x74   : > { %s2450_s25 = scalar_select %p2064_p4, 1, 0 }
  0x75   : > { %s2451_s12 = scalar_select %p2068_p10, 1, 0 }
  0x76   : > { %p264_p11 = scmp.eq.s32.totalorder %s1189_s10, 1  ;;  %p1409_p12 = scmp.lt.s32.totalorder %s1845_s16, 2 }
  0x77   : > { %2452 = sst [smem:[#allocation31_spill]] %s2451_s12  ;;  %s2074_s17 = sand.u32 1, %s1841_s15  }
  0x78   : > { %p2076_p3 = por %p264_p11, %p56_p5  ;;  %s400_s22 = sand.u32 1, %s1845_s16  }
  0x79   : > { %p2081_p0 = pnand %p1409_p12, %p52_p9  ;;  %s1200_s9 = sshll.u32 %s2074_s17, 6 }
  0x7a   : > { %s2453_s21 = scalar_select %p2076_p3, 1, 0 }
  0x7b   : > { %s2455_s18 = scalar_select %p2081_p0, 1, 0 }
  0x7c   : > { %2454 = sst [smem:[#allocation32_spill]] %s2453_s21  ;;  %s1251_s28 = sshll.u32 %s1845_s16, 10 }
  0x7d   : > { %s2456_s1 = sld [smem:[#allocation33_spill]]  ;;  %s404_s26 = scalar_lea.vmem [#allocation5], %s1200_s9 }
  0x7e   : > { %s411_s3 = sshll.u32 %s404_s26, 4  ;;  %s2094_s5 = scalar_lea.sflag [#allocation6], %s400_s22  ;;  %s2092_s3 = int_to_ptr.vmem [resolvable:$true] %s411_s3 }
  0x7f   : > { %p2100_p2 = pneg %p2081_p0 }
  0x81   : > { %s2457_s30 = scalar_select %p2100_p2, 1, 0 }
  0x83   : > { %s2090_s10 = scalar_lea.hbm %s2456_s1, %s1251_s28  ;;  %s1562_s9 = scalar_lea.hbm %s2456_s1, 2048 }
  0x84   : > { %s1557_s7 = scalar_lea.hbm %s2090_s10, 1024  ;;  %p1563_p9 = scmp.lt.u32.totalorder %s2090_s10, %s2456_s1 }
  0x85   : > { %p1558_p13 = scmp.ne.s32.totalorder %s2090_s10, %s1557_s7  ;;  %p1564_p11 = scmp.lt.u32.totalorder %s1562_s9, %s1557_s7 }
  0x86   : > { %p1566_p1 = scmp.lt.u32.totalorder %s1557_s7, %s2090_s10 }
  0x87   : > { %p1560_p5 = pnand %p2100_p2, %p1558_p13  ;;  %p1565_p12 = por %p1564_p11, %p1563_p9 }
  0x89   : > { %p1561_p7 = pneg %p1560_p5  ;;  %p1567_p3 = por %p1566_p1, %p1565_p12 }
  0x8b   : > { %p1568_p10 = pnand %p1567_p3, %p1561_p7 }
  0x8d   : > { %1571 = shalt.err (!%p1568_p10)
}
  0x8e   : > { %s1572_s22 = scalar_lea.vmem %s2092_s3, 1024  ;;  %s1852_s24 = smov [#allocation5]  }
  0x8f   : > { %p1573_p13 = scmp.ne.s32.totalorder %s2092_s3, %s1572_s22  ;;  %s1577_s28 = sshll.u32 %s1852_s24, 4  ;;  %s1578_s28 = int_to_ptr.vmem [resolvable:$false] %s1577_s28 }
  0x90   : > { %s1579_s26 = scalar_lea.vmem %s1578_s28, 2048  ;;  %p1580_p6 = scmp.lt.s32.totalorder %s2092_s3, %s1578_s28 }
  0x91   : > { %p1575_p5 = pnand %p1573_p13, %p2100_p2  ;;  %p1581_p8 = scmp.lt.s32.totalorder %s1579_s26, %s1572_s22 }
  0x93   : > { %p1576_p4 = pneg %p1575_p5  ;;  %p1582_p9 = por %p1581_p8, %p1580_p6 }
  0x95   : > { %p1583_p11 = pnand %p1582_p9, %p1576_p4 }
  0x97   : > { %1586 = shalt.err (!%p1583_p11)
}
  0x98   : > { %s2458_s7 = smov 4   ;;  %s2459_s9 = smov 64  }
  0x99   : > { %1392 = dma.hbm_to_vmem [thread:$0]  (!%p2081_p0), %s2090_s10, 1024, %s2092_s3, %s2094_s5, %s2459_s9, %s2459_s9, %s2458_s7  }
  0x9a   : > { %s1853_s29 = smov [#allocation10]   ;;  %s1854_s24 = smov [#allocation13]  }
  0x9b   : > { %s323_s1 = sshll.u32 %s1853_s29, 4  ;;  %s347_s15 = sshll.u32 %s1854_s24, 4  ;;  %s324_s1 = int_to_ptr.vmem [resolvable:$true] %s323_s1  ;;  %s348_s15 = int_to_ptr.vmem [resolvable:$true] %s347_s15 }
  0x9c   : > { %s1587_s26 = scalar_lea.hbm %s2404_s4, 16  ;;  %p2460_p3 = scmp.ne.s32.totalorder %s2445_s11, 0 }
  0x9d   : > { %p1588_p1 = scmp.ne.s32.totalorder %s2404_s4, %s1587_s26  ;;  %p1594_p4 = scmp.lt.u32.totalorder %s1587_s26, %s2404_s4 }
  0x9f   : > { %p1590_p6 = pnand %p1588_p1, %p2460_p3 }
  0xa1   : > { %p1591_p8 = pneg %p1590_p6 }
  0xa3   : > { %p1596_p10 = pnand %p1594_p4, %p1591_p8 }
  0xa5   : > { %1599 = shalt.err (!%p1596_p10)
}
  0xa6   : > { %s1600_s3 = scalar_lea.vmem %s324_s1, 16  ;;  %s1607_s10 = scalar_lea.vmem %s324_s1, 32 }
  0xa7   : > { %p1601_p7 = scmp.ne.s32.totalorder %s324_s1, %s1600_s3  ;;  %p1608_p5 = scmp.lt.s32.totalorder %s324_s1, %s324_s1 }
  0xa8   : > { %p1609_p9 = scmp.lt.s32.totalorder %s1607_s10, %s1600_s3 }
  0xa9   : > { %p1603_p12 = pnand %p1601_p7, %p2460_p3 }
  0xaa   : > { %p1610_p11 = por %p1609_p9, %p1608_p5 }
  0xab   : > { %p1604_p13 = pneg %p1603_p12 }
  0xad   : > { %p1611_p0 = pnand %p1610_p11, %p1604_p13 }
  0xaf   : > { %1614 = shalt.err (!%p1611_p0)
}
  0xb0   : > { %p2461_p1 = scmp.ne.s32.totalorder %s2443_s23, 0  ;;  %s1615_s7 = scalar_lea.hbm %s2406_s6, 16 }
  0xb1   : > { %p1616_p6 = scmp.ne.s32.totalorder %s2406_s6, %s1615_s7  ;;  %p1622_p0 = scmp.lt.u32.totalorder %s1615_s7, %s2406_s6 }
  0xb2   : > { %1373 = dma.hbm_to_vmem [thread:$0]  (!%p2461_p1), %s2404_s4, 16, %s324_s1, [#allocation9]  }
  0xb3   : > { %p1618_p8 = pnand %p1616_p6, %p2460_p3 }
  0xb5   : > { %p1619_p4 = pneg %p1618_p8 }
  0xb7   : > { %p1624_p10 = pnand %p1622_p0, %p1619_p4 }
  0xb9   : > { %1627 = shalt.err (!%p1624_p10)
}
  0xba   : > { %s1628_s22 = scalar_lea.vmem %s348_s15, 16  ;;  %s1635_s1 = scalar_lea.vmem %s348_s15, 32 }
  0xbb   : > { %p1629_p7 = scmp.ne.s32.totalorder %s348_s15, %s1628_s22  ;;  %p1636_p5 = scmp.lt.s32.totalorder %s348_s15, %s348_s15 }
  0xbc   : > { %p1637_p9 = scmp.lt.s32.totalorder %s1635_s1, %s1628_s22 }
  0xbd   : > { %p1631_p12 = pnand %p1629_p7, %p2460_p3 }
  0xbe   : > { %p1638_p11 = por %p1637_p9, %p1636_p5 }
  0xbf   : > { %p1632_p13 = pneg %p1631_p12 }
  0xc1   : > { %p1639_p2 = pnand %p1638_p11, %p1632_p13 }
  0xc3   : > { %1642 = shalt.err (!%p1639_p2)
}
  0xc4   : > { %1379 = dma.hbm_to_vmem [thread:$0]  (!%p2461_p1), %s2406_s6, 16, %s348_s15, [#allocation12]  }
  0xc5   : > { %s1855_s10 = smov [#allocation16]   ;;  %s1198_s21 = sshll.u32 %s2074_s17, 2 }
  0xc6   : > { %s371_s27 = sshll.u32 %s1855_s10, 4  ;;  %s1643_s7 = scalar_lea.hbm %s2408_s8, 16  ;;  %s372_s27 = int_to_ptr.vmem [resolvable:$true] %s371_s27 }
  0xc7   : > { %p1644_p2 = scmp.ne.s32.totalorder %s2408_s8, %s1643_s7  ;;  %p1650_p4 = scmp.lt.u32.totalorder %s1643_s7, %s2408_s8 }
  0xc9   : > { %p1646_p6 = pnand %p1644_p2, %p2460_p3 }
  0xcb   : > { %p1647_p8 = pneg %p1646_p6 }
  0xcd   : > { %p1652_p0 = pnand %p1650_p4, %p1647_p8 }
  0xcf   : > { %1655 = shalt.err (!%p1652_p0)
}
  0xd0   : > { %s1656_s15 = scalar_lea.vmem %s372_s27, 16  ;;  %s1663_s22 = scalar_lea.vmem %s372_s27, 32 }
  0xd1   : > { %p1657_p10 = scmp.ne.s32.totalorder %s372_s27, %s1656_s15  ;;  %p1664_p13 = scmp.lt.s32.totalorder %s372_s27, %s372_s27 }
  0xd2   : > { %p1665_p5 = scmp.lt.s32.totalorder %s1663_s22, %s1656_s15 }
  0xd3   : > { %p1659_p7 = pnand %p1657_p10, %p2460_p3 }
  0xd4   : > { %p1666_p9 = por %p1665_p5, %p1664_p13 }
  0xd5   : > { %p1660_p12 = pneg %p1659_p7 }
  0xd7   : > { %p1667_p11 = pnand %p1666_p9, %p1660_p12 }
  0xd9   : > { %1670 = shalt.err (!%p1667_p11)
}
  0xda   : > { %1385 = dma.hbm_to_vmem [thread:$0]  (!%p2461_p1), %s2408_s8, 16, %s372_s27, [#allocation15]  }
  0xdb   : > { %s1199_s11 = sshll.u32 %s1845_s16, 6  ;;  %s386_s23 = scalar_lea.vmem [#allocation2], %s1198_s21 }
  0xdc   : > { %s2188_s13 = scalar_lea.hbm %s2400_s0, %s1199_s11  ;;  %s393_s12 = sshll.u32 %s386_s23, 4  ;;  %s394_s12 = int_to_ptr.vmem [resolvable:$true] %s393_s12 }
  0xdd   : > { %s383_s7 = scalar_lea.sflag [#allocation3], %s2074_s17  ;;  %s1671_s9 = scalar_lea.hbm %s2188_s13, 64 }
  0xde   : > { %p1672_p3 = scmp.ne.s32.totalorder %s2188_s13, %s1671_s9  ;;  %p2462_p2 = scmp.ne.s32.totalorder %s2457_s30, 0 }
  0xdf   : > { %s1676_s24 = scalar_lea.hbm %s2400_s0, 128  ;;  %p1677_p8 = scmp.lt.u32.totalorder %s2188_s13, %s2400_s0 }
  0xe0   : > { %p1674_p1 = pnand %p1672_p3, %p2462_p2  ;;  %p1678_p4 = scmp.lt.u32.totalorder %s1676_s24, %s1671_s9 }
  0xe1   : > { %p1680_p10 = scmp.lt.u32.totalorder %s1671_s9, %s2188_s13 }
  0xe2   : > { %p1675_p6 = pneg %p1674_p1  ;;  %p1679_p0 = por %p1678_p4, %p1677_p8 }
  0xe4   : > { %p1681_p7 = por %p1680_p10, %p1679_p0 }
  0xe6   : > { %p1682_p12 = pnand %p1681_p7, %p1675_p6 }
  0xe8   : > { %1685 = shalt.err (!%p1682_p12)
}
  0xe9   : > { %s1686_s22 = scalar_lea.vmem %s394_s12, 64  ;;  %s1856_s1 = smov [#allocation2]  }
  0xea   : > { %p1687_p13 = scmp.ne.s32.totalorder %s394_s12, %s1686_s22  ;;  %s1691_s26 = sshll.u32 %s1856_s1, 4  ;;  %s1692_s26 = int_to_ptr.vmem [resolvable:$false] %s1691_s26 }
  0xeb   : > { %s1693_s3 = scalar_lea.vmem %s1692_s26, 128  ;;  %p1694_p11 = scmp.lt.s32.totalorder %s394_s12, %s1692_s26 }
  0xec   : > { %p1689_p5 = pnand %p1687_p13, %p2462_p2  ;;  %p1695_p3 = scmp.lt.s32.totalorder %s1693_s3, %s1686_s22 }
  0xee   : > { %p1690_p9 = pneg %p1689_p5  ;;  %p1696_p1 = por %p1695_p3, %p1694_p11 }
  0xf0   : > { %p1697_p4 = pnand %p1696_p1, %p1690_p9 }
  0xf2   : > { %1700 = shalt.err (!%p1697_p4)
}
  0xf3   : > { %p2463_p8 = scmp.ne.s32.totalorder %s2455_s18, 0  ;;  %s2215_s9 = scalar_lea.hbm %s2402_s2, %s1199_s11 }
  0xf4   : > { %s425_s27 = scalar_lea.vmem [#allocation7], %s1198_s21  ;;  %s1701_s24 = scalar_lea.hbm %s2215_s9, 64 }
  0xf5   : > { %1389 = dma.hbm_to_vmem [thread:$0]  (!%p2463_p8), %s2188_s13, 64, %s394_s12, %s383_s7  }
  0xf6   : > { %s432_s29 = sshll.u32 %s425_s27, 4  ;;  %p1702_p6 = scmp.ne.s32.totalorder %s2215_s9, %s1701_s24  ;;  %s433_s29 = int_to_ptr.vmem [resolvable:$true] %s432_s29 }
  0xf7   : > { %s1706_s7 = scalar_lea.hbm %s2402_s2, 128  ;;  %p1707_p7 = scmp.lt.u32.totalorder %s2215_s9, %s2402_s2 }
  0xf8   : > { %p1704_p0 = pnand %p1702_p6, %p2462_p2  ;;  %p1708_p12 = scmp.lt.u32.totalorder %s1706_s7, %s1701_s24 }
  0xf9   : > { %p1710_p5 = scmp.lt.u32.totalorder %s1701_s24, %s2215_s9 }
  0xfa   : > { %p1705_p10 = pneg %p1704_p0  ;;  %p1709_p13 = por %p1708_p12, %p1707_p7 }
  0xfc   : > { %p1711_p9 = por %p1710_p5, %p1709_p13 }
  0xfe   : > { %p1712_p11 = pnand %p1711_p9, %p1705_p10 }
 0x100   : > { %1715 = shalt.err (!%p1712_p11)
}
 0x101   : > { %s1716_s17 = scalar_lea.vmem %s433_s29, 64  ;;  %s1857_s21 = smov [#allocation7]  }
 0x102   : > { %p1717_p3 = scmp.ne.s32.totalorder %s433_s29, %s1716_s17  ;;  %s1721_s15 = sshll.u32 %s1857_s21, 4  ;;  %s1722_s15 = int_to_ptr.vmem [resolvable:$false] %s1721_s15 }
 0x103   : > { %s1723_s22 = scalar_lea.vmem %s1722_s15, 128  ;;  %p1724_p6 = scmp.lt.s32.totalorder %s433_s29, %s1722_s15 }
 0x104   : > { %p1719_p1 = pnand %p1717_p3, %p2462_p2  ;;  %p1725_p0 = scmp.lt.s32.totalorder %s1723_s22, %s1716_s17 }
 0x106   : > { %p1720_p4 = pneg %p1719_p1  ;;  %p1726_p8 = por %p1725_p0, %p1724_p6 }
 0x108   : > { %p1727_p7 = pnand %p1726_p8, %p1720_p4 }
 0x10a   : > { %1730 = shalt.err (!%p1727_p7)
}
 0x10b   : > { %p2464_p12 = scmp.ne.s32.totalorder %s2455_s18, 0  ;;  %p2465_p10 = scmp.ne.s32.totalorder %s2442_s20, 0 }
 0x10c   : > { %s2240_s30 = sand.u32 (!%p2465_p10), 1, %s1837_s14   ;;  %p2466_p2 = scmp.ne.s32.totalorder (!%p2465_p10), %s2450_s25, 0 }
 0x10d   : > { %1395 = dma.hbm_to_vmem [thread:$0]  (!%p2464_p12), %s2215_s9, 64, %s433_s29, %s2094_s5  }
 0x10e   : > { %441 = sbr.rel (%p2465_p10) target bundleno = 818 (0x332), region = 56  ;;  %s1206_s1 = sshll.u32 (!%p2465_p10), %s2240_s30, 2 }
 0x10f   : > { %s444_s26 = scalar_lea.sflag (!%p2465_p10), [#allocation3], %s2240_s30  ;;  %s447_s3 = scalar_lea.vmem (!%p2465_p10), [#allocation2], %s1206_s1 }
 0x115   : > { %1804 = dma.done.wait (%p2466_p2), %s444_s26, 64  }
 0x116   : > { %1806 = vsyncadd (%p2466_p2), %s444_s26, 4294967232  ;;  %s452_s5 = sand.u32 1, %s1938_s19   ;;  %s1207_s20 = sshll.u32 %s2240_s30, 6 }
 0x117   : > { %s453_s18 = scalar_lea.sflag [#allocation6], %s452_s5  ;;  %s2250_s10 = scalar_lea.vmem [#allocation5], %s1207_s20 }
 0x118   : > { %1808 = dma.done.wait (%p2466_p2), %s453_s18, 1088  }
 0x119   : > { %1810 = vsyncadd (%p2466_p2), %s453_s18, 4294966208  ;;  %s2256_s23 = scalar_lea.vmem [#allocation7], %s1206_s1  ;;  %p2467_p8 = scmp.eq.s32.totalorder %s1938_s19, 0 }
 0x11b   : > { %1812 = dma.done.wait (%p2467_p8), [#allocation9], 272   ;;  %p2468_p13 = pmov %p2467_p8 }
 0x11c   : > { %p2469_p5 = pmov %p2467_p8 }
 0x11d   : > { %1814 = vsyncadd (%p2468_p13), [#allocation9], 4294967024 }
 0x11e   : > { %1816 = dma.done.wait (%p2469_p5), [#allocation12], 272   ;;  %p2470_p9 = pmov %p2469_p5 }
 0x11f   : > { %p2471_p11 = pmov %p2469_p5 }
 0x120   : > { %1818 = vsyncadd (%p2470_p9), [#allocation12], 4294967024 }
 0x121   : > { %1820 = dma.done.wait (%p2471_p11), [#allocation15], 272   ;;  %p2472_p3 = pmov %p2469_p5 }
 0x122   : > { %v1858_v0 = vmov 0.0   ;;  %vm1859_vm0 = vmmov 0   ;;  %v1459_v1 = vld [vmem:[#allocation8] sm:$0xff]   ;;  %v1460_v2 = vld [vmem:[#allocation8 + $0x8] sm:$0xff]   ;;  %v1461_v3 = vld [vmem:[#allocation11] sm:$0xff]   ;;  %vm583_vm1 = vcmask 261120  }
 0x123   : > { %1822 = vsyncadd (%p2472_p3), [#allocation15], 4294967024  ;;  %1277 = vmatprep.subr.bf16.mxu0 %v1858_v0  ;;  %1281 = vmatprep.mubr.msk.bf16.mxu0 %vm1859_vm0, %v1858_v0  ;;  %v542_v4 = vld [vmem:[%s447_s3] sm:$0xf]  ;;  %v1463_v5 = vld [vmem:[%s2250_s10] sm:$0xff]   ;;  %s1215_s25 = sshll.u32 %s2240_s30, 3 }
 0x124   : > { %1313 = vmatprep.subr.bf16.mxu1 %v1858_v0  ;;  %1329 = vmatprep.mubr.msk.bf16.mxu1 %vm1859_vm0, %v1858_v0  ;;  %v1462_v6 = vld [vmem:[#allocation11 + $0x8] sm:$0xff]   ;;  %v1465_v8 = vld [vmem:[%s2250_s10 + $0x10] sm:$0xff]   ;;  %v1466_v9 = vld [vmem:[%s2250_s10 + $0x18] sm:$0xff]   ;;  %s2473_s9 = sld [smem:[#allocation31_spill]]  ;;  %s540_s27 = scalar_lea.vmem [#allocation18], %s1215_s25 }
 0x125   : > { %1278 = vmatpush3.bf16.msra.mxu0 %v1459_v1  ;;  %v1464_v7 = vld [vmem:[%s2250_s10 + $0x8] sm:$0xff]   ;;  %v1467_v10 = vld [vmem:[%s2250_s10 + $0x20] sm:$0xff]   ;;  %v1469_v12 = vld [vmem:[%s2250_s10 + $0x30] sm:$0xff]   ;;  %s1247_s29 = sshll.u32 %s1938_s19, 7  ;;  %s2474_s12 = sld [smem:[#allocation38_spill]] }
 0x126   : > { %1279 = vmatprep.subr.bf16.mxu0 %v1858_v0  ;;  %v1468_v11 = vld [vmem:[%s2250_s10 + $0x28] sm:$0xff]   ;;  %v1470_v13 = vld [vmem:[%s2250_s10 + $0x38] sm:$0xff]   ;;  %v559_v16 = vld [vmem:[%s2256_s23] sm:$0xf]  ;;  %s987_s28 = sshll.u32 %s540_s27, 4  ;;  %s961_s11 = scalar_lea.sflag [#allocation19], %s2240_s30  ;;  %s988_s28 = int_to_ptr.vmem [resolvable:$true] %s987_s28 }
 0x127   : > { %v1471_v14 = vld [vmem:[#allocation14] sm:$0xff]   ;;  %v1472_v15 = vld [vmem:[#allocation14 + $0x8] sm:$0xff]   ;;  %v1221_v22 = vld [vmem:[#allocation13] ss:$0 sm:$0xff]  ;;  %s1731_s17 = scalar_lea.vmem %s988_s28, 128  ;;  %s1860_s21 = smov [#allocation18]  }
 0x128   : > { %p1732_p1 = scmp.ne.s32.totalorder %s988_s28, %s1731_s17  ;;  %s1735_s15 = sshll.u32 %s1860_s21, 4  ;;  %s1736_s15 = int_to_ptr.vmem [resolvable:$false] %s1735_s15 }
 0x129   : > { %1280 = vmatpush3.bf16.msra.mxu0 %v1460_v2  ;;  %s1737_s22 = scalar_lea.vmem %s1736_s15, 256  ;;  %p1738_p7 = scmp.lt.s32.totalorder %s988_s28, %s1736_s15 }
 0x12a   : > { %1285 = vmatprep.subr.bf16.mxu0 %v1461_v3  ;;  %p2475_p4 = scmp.ne.s32.totalorder %s2473_s9, 0  ;;  %p1739_p12 = scmp.lt.s32.totalorder %s1737_s22, %s1731_s17 }
 0x12b   : > { %s2329_s7 = scalar_lea.hbm %s2474_s12, %s1247_s29 }
 0x12c   : > { %1282 = vmatmul.mubr.msk.bf16.vlgmr.msra.gmra.mrb[0].mxu0 %vm583_vm1, %v542_v4  ;;  %p1733_p6 = pnand %p1732_p1, %p2475_p4  ;;  %p1740_p10 = por %p1739_p12, %p1738_p7 }
 0x12d   : > { %1286 = vmatpush3.bf16.msra.mxu0 %v1461_v3  ;;  %1289 = vmatprep.mubr.msk.bf16.mxu0 %vm583_vm1, %v1463_v5 }
 0x12e   : > { %1287 = vmatprep.subr.bf16.mxu0 %v1462_v6  ;;  %p1734_p0 = pneg %p1733_p6 }
 0x130   : > { %p1741_p2 = pnand %p1740_p10, %p1734_p0 }
 0x131   : > { %1288 = vmatpush3.bf16.msra.mxu0 %v1462_v6  ;;  %v1217_v6 = vld [vmem:[#allocation10] ss:$0 sm:$0xff] }
 0x132   : > { %1305 = vmatprep.subr.bf16.mxu0 %v1858_v0 }
 0x134   : > { %1290 = vmatmul.mubr.msk.bf16.vlgmr.msra.gmra.mrb[4].mxu0 %vm583_vm1, %v1464_v7 }
 0x135   : > { %1293 = vmatprep.mubr.msk.bf16.mxu0 %vm583_vm1, %v1465_v8  ;;  %1306 = vmatpush3.bf16.msra.mxu0 %v1471_v14 }
 0x136   : > { %1307 = vmatprep.subr.bf16.mxu0 %v1858_v0 }
 0x139   : > { %1308 = vmatpush3.bf16.msra.mxu0 %v1472_v15 }
 0x13c   : > { %1294 = vmatmul.mubr.msk.bf16.gmra.mrb[8].mxu0 %vm583_vm1, %v1466_v9 }
 0x13d   : > { %1297 = vmatprep.mubr.msk.bf16.mxu0 %vm583_vm1, %v1467_v10  ;;  %v1240_v10 = vld [vmem:[#allocation16] ss:$0 sm:$0xff] }
 0x144   : > { %1298 = vmatmul.mubr.msk.bf16.gmra.mrb[12].mxu0 %vm583_vm1, %v1468_v11 }
 0x145   : > { %1301 = vmatprep.mubr.msk.bf16.mxu0 %vm583_vm1, %v1469_v12 }
 0x14c   : > { %1302 = vmatmul.mubr.msk.bf16.gmra.mrb[16].mxu0 %vm583_vm1, %v1470_v13 }
 0x14d   : > { %1309 = vmatprep.mubr.msk.bf16.mxu0 %vm1859_vm0, %v1858_v0 }
 0x154   : > { %1310 = vmatmul.mubr.msk.bf16.vlgmr.msra.gmra.mrb[20].mxu0 %vm583_vm1, %v559_v16 }
 0x1ff   : > { %v2300_v17 = vpop.f32.mrb[0].mxu0 }
 0x200   : > { %v1283_v18 = vpop.f32.mrb[1].mxu0  ;;  %v622_v8 = vadd.f32 %v1217_v6, %v2300_v17 }
 0x201   : > { %v624_v19 = vpop.f32.mrb[2].mxu0 }
 0x202   : > { %v1284_v20 = vpop.f32.mrb[3].mxu0  ;;  %v878_v9 = vpack.c.bf16 %v622_v8, %v622_v8 }
 0x207   : > { %v1291_v21 = vpop.f32.mrb[4].mxu0 }
 0x208   : > { %v748_v23 = vpop.f32.mrb[5].mxu0  ;;  %v757_v25 = vadd.f32 %v1291_v21, %v1221_v22 }
 0x209   : > { %v1292_v24 = vpop.f32.mrb[6].mxu0  ;;  %v749_v28 = vadd.f32 %v1221_v22, %v748_v23 }
 0x20a   : > { %v760_v26 = vadd.f32 %v1292_v24, %v1221_v22  ;;  %v751_v27 = vpop.f32.mrb[7].mxu0 }
 0x20b   : > { %v752_v29 = vadd.f32 %v1221_v22, %v751_v27 }
 0x20c   : > { %v880_v30 = vpack.c.bf16 %v760_v26, %v757_v25 }
 0x20d   : > { %v879_v31 = vpack.c.bf16 %v752_v29, %v749_v28 }
 0x20e   : > { %v894_v43 = vsel %vm583_vm1, %v880_v30, 0 }
 0x20f   : > { %v891_v32 = vsel %vm583_vm1, %v879_v31, 0  ;;  %v1295_v33 = vpop.f32.mrb[8].mxu0 }
 0x210   : > { %1314 = vmatpush3.bf16.xpose.msra.mxu1 %v891_v32  ;;  %v773_v34 = vadd.f32 %v1295_v33, %v1221_v22  ;;  %v764_v35 = vpop.f32.mrb[9].mxu0 }
 0x211   : > { %v765_v36 = vadd.f32 %v1221_v22, %v764_v35  ;;  %v1296_v37 = vpop.f32.mrb[10].mxu0  ;;  %1315 = vmatprep.subr.bf16.mxu1 %v1858_v0 }
 0x212   : > { %v776_v38 = vadd.f32 %v1296_v37, %v1221_v22  ;;  %v767_v39 = vpop.f32.mrb[11].mxu0 }
 0x213   : > { %v768_v40 = vadd.f32 %v1221_v22, %v767_v39 }
 0x214   : > { %v882_v41 = vpack.c.bf16 %v776_v38, %v773_v34 }
 0x215   : > { %v881_v42 = vpack.c.bf16 %v768_v40, %v765_v36 }
 0x216   : > { %v900_v2 = vsel %vm583_vm1, %v882_v41, 0 }
 0x217   : > { %v1299_v44 = vpop.f32.mrb[12].mxu0  ;;  %v897_v54 = vsel %vm583_vm1, %v881_v42, 0 }
 0x218   : > { %1316 = vmatpush3.bf16.xpose.msra.mxu1 %v894_v43  ;;  %v789_v45 = vadd.f32 %v1299_v44, %v1221_v22  ;;  %v780_v46 = vpop.f32.mrb[13].mxu0 }
 0x219   : > { %1317 = vmatprep.subr.bf16.mxu1 %v1858_v0  ;;  %v781_v47 = vadd.f32 %v1221_v22, %v780_v46  ;;  %v1300_v48 = vpop.f32.mrb[14].mxu0 }
 0x21a   : > { %v792_v49 = vadd.f32 %v1300_v48, %v1221_v22  ;;  %v783_v50 = vpop.f32.mrb[15].mxu0 }
 0x21b   : > { %v784_v51 = vadd.f32 %v1221_v22, %v783_v50 }
 0x21c   : > { %v884_v52 = vpack.c.bf16 %v792_v49, %v789_v45 }
 0x21d   : > { %v883_v53 = vpack.c.bf16 %v784_v51, %v781_v47 }
 0x21e   : > { %v906_v4 = vsel %vm583_vm1, %v884_v52, 0 }
 0x21f   : > { %v1303_v55 = vpop.f32.mrb[16].mxu0  ;;  %v903_v3 = vsel %vm583_vm1, %v883_v53, 0 }
 0x220   : > { %1318 = vmatpush3.bf16.xpose.msra.mxu1 %v897_v54  ;;  %v805_v56 = vadd.f32 %v1303_v55, %v1221_v22  ;;  %v796_v57 = vpop.f32.mrb[17].mxu0 }
 0x221   : > { %1319 = vmatprep.subr.bf16.mxu1 %v1858_v0  ;;  %v797_v58 = vadd.f32 %v1221_v22, %v796_v57  ;;  %v1304_v59 = vpop.f32.mrb[18].mxu0 }
 0x222   : > { %v808_v60 = vadd.f32 %v1304_v59, %v1221_v22  ;;  %v799_v61 = vpop.f32.mrb[19].mxu0 }
 0x223   : > { %v800_v62 = vadd.f32 %v1221_v22, %v799_v61 }
 0x224   : > { %v886_v63 = vpack.c.bf16 %v808_v60, %v805_v56 }
 0x225   : > { %v885_v1 = vpack.c.bf16 %v800_v62, %v797_v58 }
 0x226   : > { %v912_v7 = vsel %vm583_vm1, %v886_v63, 0 }
 0x227   : > { %v909_v5 = vsel %vm583_vm1, %v885_v1, 0  ;;  %v871_v11 = vpop.f32.mrb[20].mxu0 }
 0x228   : > { %1320 = vmatpush3.bf16.xpose.msra.mxu1 %v900_v2  ;;  %v872_v12 = vadd.f32 %v1240_v10, %v871_v11  ;;  %v1311_v13 = vpop.f32.mrb[21].mxu0 }
 0x229   : > { %1321 = vmatprep.subr.bf16.mxu1 %v1858_v0  ;;  %v874_v14 = vpop.f32.mrb[22].mxu0 }
 0x22a   : > { %877 = vst.msk [vmem:[%s540_s27] sm:$0xff] %vm583_vm1, %v872_v12 }
 0x230   : > { %1322 = vmatpush3.bf16.xpose.msra.mxu1 %v903_v3 }
 0x231   : > { %1323 = vmatprep.subr.bf16.mxu1 %v1858_v0 }
 0x238   : > { %1324 = vmatpush3.bf16.xpose.msra.mxu1 %v906_v4 }
 0x239   : > { %1325 = vmatprep.subr.bf16.mxu1 %v1858_v0 }
 0x240   : > { %1326 = vmatpush3.bf16.xpose.msra.mxu1 %v909_v5 }
 0x241   : > { %1327 = vmatprep.subr.bf16.mxu1 %v1858_v0  ;;  %v1312_v0 = vpop.f32.mrb[23].mxu0 }
 0x248   : > { %1328 = vmatpush3.bf16.xpose.msra.mxu1 %v912_v7 }
 0x24f   : > { %1330 = vmatmul.mubr.msk.bf16.vlgmr.msra.gmra.mrb[0].mxu1 %vm583_vm1, %v878_v9 }
 0x250   : > { %1744 = shalt.err (!%p1741_p2)
}
 0x251   : > { %s1745_s1 = scalar_lea.hbm %s2329_s7, 128  ;;  %s1749_s5 = scalar_lea.hbm %s2474_s12, 256 }
 0x252   : > { %p1746_p8 = scmp.ne.s32.totalorder %s2329_s7, %s1745_s1  ;;  %p1750_p9 = scmp.lt.u32.totalorder %s2329_s7, %s2474_s12 }
 0x253   : > { %p1751_p11 = scmp.lt.u32.totalorder %s1749_s5, %s1745_s1  ;;  %p1753_p1 = scmp.lt.u32.totalorder %s1745_s1, %s2329_s7 }
 0x254   : > { %p1747_p13 = pnand %p1746_p8, %p2475_p4 }
 0x255   : > { %p1752_p3 = por %p1751_p11, %p1750_p9 }
 0x256   : > { %p1748_p5 = pneg %p1747_p13 }
 0x257   : > { %p1754_p6 = por %p1753_p1, %p1752_p3 }
 0x259   : > { %p1755_p0 = pnand %p1754_p6, %p1748_p5 }
 0x25b   : > { %1758 = shalt.err (!%p1755_p0)
}
 0x25c   : > { %1364 = dma.vmem_to_hbm [thread:$0]  (%p2475_p4), %s988_s28, 128, %s2329_s7, %s961_s11  }
 0x25d   : > { %s533_s10 = scalar_lea.vmem [#allocation17], %s1215_s25  ;;  %s2476_s13 = sld [smem:[#allocation37_spill]] }
 0x25e   : > { %s974_s23 = sshll.u32 %s533_s10, 4  ;;  %s956_s15 = scalar_lea.sflag [#allocation4], %s2240_s30  ;;  %s2351_s23 = int_to_ptr.vmem [resolvable:$true] %s974_s23 }
 0x25f   : > { %s1759_s7 = scalar_lea.vmem %s2351_s23, 128  ;;  %s1861_s25 = smov [#allocation17]  }
 0x260   : > { %p1760_p7 = scmp.ne.s32.totalorder %s2351_s23, %s1759_s7  ;;  %s1763_s19 = sshll.u32 %s1861_s25, 4  ;;  %s1764_s19 = int_to_ptr.vmem [resolvable:$false] %s1763_s19 }
 0x261   : > { %s1765_s28 = scalar_lea.vmem %s1764_s19, 256  ;;  %p1766_p2 = scmp.lt.s32.totalorder %s2351_s23, %s1764_s19 }
 0x262   : > { %p1761_p12 = pnand %p1760_p7, %p2475_p4  ;;  %p1767_p8 = scmp.lt.s32.totalorder %s1765_s28, %s1759_s7 }
 0x263   : > { %s2477_s17 = smov %s2476_s13  ;;  %s2358_s21 = scalar_lea.hbm %s2476_s13, %s1247_s29 }
 0x264   : > { %p1762_p10 = pneg %p1761_p12  ;;  %p1768_p13 = por %p1767_p8, %p1766_p2 }
 0x266   : > { %p1769_p5 = pnand %p1768_p13, %p1762_p10 }
 0x322   : > { %v948_v15 = vpop.f32.mrb[0].mxu1 }
 0x323   : > { %954 = vst [vmem:[%s533_s10] sm:$0xff] %v948_v15  ;;  %v1331_v16 = vpop.f32.mrb[1].mxu1 }
 0x324   : > { %v951_v17 = vpop.f32.mrb[2].mxu1 }
 0x325   : > { %1772 = shalt.err (!%p1769_p5)
}
 0x326   : > { %s1773_s30 = scalar_lea.hbm %s2358_s21, 128  ;;  %s1777_s22 = scalar_lea.hbm %s2477_s17, 256 }
 0x327   : > { %p1774_p9 = scmp.ne.s32.totalorder %s2358_s21, %s1773_s30  ;;  %p1778_p1 = scmp.lt.u32.totalorder %s2358_s21, %s2477_s17 }
 0x328   : > { %p1779_p6 = scmp.lt.u32.totalorder %s1777_s22, %s1773_s30  ;;  %p1781_p7 = scmp.lt.u32.totalorder %s1773_s30, %s2358_s21 }
 0x329   : > { %p1775_p11 = pnand %p1774_p9, %p2475_p4 }
 0x32a   : > { %p1780_p0 = por %p1779_p6, %p1778_p1 }
 0x32b   : > { %p1776_p3 = pneg %p1775_p11 }
 0x32c   : > { %p1782_p12 = por %p1781_p7, %p1780_p0 }
 0x32e   : > { %p1783_p10 = pnand %p1782_p12, %p1776_p3 }
 0x330   : > { %1786 = shalt.err (!%p1783_p10)
}
 0x331   : > { %1363 = dma.vmem_to_hbm [thread:$0]  (%p2475_p4), %s2351_s23, 128, %s2358_s21, %s956_s15   ;;  %v1332_v18 = vpop.f32.mrb[3].mxu1 }
 0x332 PF: > { %s2478_s3 = sld [smem:[#allocation27_spill]]  ;;  %s2479_s5 = sld [smem:[#allocation32_spill]] }
 0x333   : > { %p2481_p8 = scmp.ge.s32.totalorder %s1845_s16, 2 }
 0x338   : > { %s999_s20 = sand.u32 1, %s2478_s3   ;;  %p2480_p2 = scmp.ne.s32.totalorder %s2479_s5, 0 }
 0x339   : > { %s1000_s18 = scalar_lea.sflag [#allocation4], %s999_s20 }
 0x33a   : > { %p1397_p13 = pnand %p2481_p8, %p2480_p2 }
 0x33c   : > { %1824 = dma.done.wait (!%p1397_p13), %s1000_s18, 128  }
 0x33d   : > { %1826 = vsyncadd (!%p1397_p13), %s1000_s18, 4294967168  ;;  %s1009_s10 = scalar_lea.sflag [#allocation19], %s999_s20 }
 0x33e   : > { %1828 = dma.done.wait (!%p1397_p13), %s1009_s10, 128  }
 0x33f   : > { %1830 = vsyncadd (!%p1397_p13), %s1009_s10, 4294967168  ;;  %s2482_s16 = sld [smem:[#allocation29_spill]]  ;;  %s2483_s9 = sld [smem:[#allocation28_spill]] }
 0x340   : > { %s2484_s15 = sld [smem:[#allocation30_spill]]  ;;  %s2485_s13 = smov %s1837_s14 }
 0x345   : > { %p33_p4 = scmp.ge.s32.totalorder %s2482_s16, 4   ;;  %s2486_s14 = smov %s2483_s9 }
 0x347   :  { %35 = sbr.rel (!%p33_p4) target bundleno = 19 (0x13), region = 166 }
 0x34e   :  { %1014 = vsyncpa [#allocation3], 1 }
 0x34f   :  { %1016 = vsyncpa [#allocation3 + $0x1], 1 }
 0x350   :  { %1017 = vsyncpa [#allocation6], 1 }
 0x351   :  { %1019 = vsyncpa [#allocation6 + $0x1], 1 }
 0x352   :  { %1020 = vsyncpa [#allocation9], 1 }
 0x353   :  { %1021 = vsyncpa [#allocation12], 1 }
 0x354   :  { %1022 = vsyncpa [#allocation15], 1 }
 0x355   :  { %1023 = vsyncpa [#allocation4], 1 }
 0x356   :  { %1025 = vsyncpa [#allocation4 + $0x1], 1 }
 0x357   :  { %1026 = vsyncpa [#allocation19], 1 }
 0x358   :  { %1028 = vsyncpa [#allocation19 + $0x1], 1 }

</bundles_post_ra>
